<compile_context>
chip_gen: v6e
topology: v6e:2x2x1
jax: 0.10.0
libtpu: 0.0.40
codegen_flags: <defaults>
</compile_context>

<pallas_src>
import functools
import math

import jax
import jax.numpy as jnp
from jax.experimental import pallas as pl
from jax.experimental.pallas import tpu as pltpu

LAYER_SIZES = [3, 3, 3, 3, 3, 1]
USE_SHORTCUT = True

LANES = 128                 # rows live on the 128-lane axis
ROW_ALIGN = 8 * LANES       # pad row count so the group axis is a multiple of 8
MAX_BLOCK_GROUPS = 512      # 512 * 128 = 65536 rows per grid step (~768 KiB in)


def _round_up(x, m):
    return (x + m - 1) // m * m


def _gelu_tanh(x):
    # tanh-approx GELU, exactly like the custom GELU module in the spec.
    c = jnp.float32(math.sqrt(2.0 / math.pi))
    return 0.5 * x * (1.0 + jnp.tanh(c * (x + 0.044715 * (x * x * x))))


def _deep_mlp_kernel(layer_sizes, shortcut_flags, w_ref, b_ref, x_ref, o_ref):
    """One block of rows, all 5 layers fused; pure VPU/EUP (no MXU).

    w_ref, b_ref : 1-D SMEM refs (scalar prefetch) with flattened weights/biases.
    x_ref : (in_feat, GB, 128) block — feature f of row g*128+l at [f, g, l].
    o_ref : (out_feat, GB, 128) block, lane-dense output.
    """
    # Each feature plane is a dense (GB, 128) tile: full vreg utilization.
    feats = [x_ref[i] for i in range(layer_sizes[0])]
    w_off = 0
    b_off = 0
    for li in range(len(layer_sizes) - 1):
        n_in, n_out = layer_sizes[li], layer_sizes[li + 1]
        new_feats = []
        for j in range(n_out):
            # Linear: out_j = sum_i x_i * W[i, j] + b[j]  (scalar-broadcast VPU ops)
            h = feats[0] * w_ref[w_off + j]
            for i in range(1, n_in):
                h = h + feats[i] * w_ref[w_off + i * n_out + j]
            h = _gelu_tanh(h + b_ref[b_off + j])
            if shortcut_flags[li]:      # static: layer_sizes[li] == layer_sizes[li+1]
                h = feats[j] + h
            new_feats.append(h)
        feats = new_feats
        w_off += n_in * n_out
        b_off += n_out
    for j in range(layer_sizes[-1]):
        o_ref[j] = feats[j].astype(o_ref.dtype)


def init_params(key, layer_sizes):
    """Deterministic init mimicking torch.nn.Linear defaults:
    U(-1/sqrt(fan_in), 1/sqrt(fan_in)) for both weight and bias; W is (in, out)."""
    params = []
    for i in range(len(layer_sizes) - 1):
        fan_in, fan_out = layer_sizes[i], layer_sizes[i + 1]
        key, kw, kb = jax.random.split(key, 3)
        bound = 1.0 / math.sqrt(fan_in)
        w = jax.random.uniform(kw, (fan_in, fan_out), jnp.float32, -bound, bound)
        b = jax.random.uniform(kb, (fan_out,), jnp.float32, -bound, bound)
        params.append((w, b))
    return params


def make_forward(params, layer_sizes, use_shortcut):
    """Flattens the params once, returns a jitted forward(x)."""
    n_layers = len(params)
    in_feat, out_feat = layer_sizes[0], layer_sizes[-1]

    # All weights/biases flattened into two tiny 1-D f32 arrays (39 + 13 values)
    # that the kernel reads as scalars out of SMEM via scalar prefetch.
    w_flat = jnp.concatenate([w.reshape(-1) for (w, _) in params]).astype(jnp.float32)
    b_flat = jnp.concatenate([b.reshape(-1) for (_, b) in params]).astype(jnp.float32)

    shortcut_flags = tuple(
        bool(use_shortcut and layer_sizes[i] == layer_sizes[i + 1])
        for i in range(n_layers)
    )
    kernel = functools.partial(_deep_mlp_kernel, tuple(layer_sizes), shortcut_flags)

    @jax.jit
    def forward(x):
        lead_shape = x.shape[:-1]
        rows = 1
        for d in lead_shape:
            rows *= d
        x2 = x.reshape(rows, in_feat).astype(jnp.float32)

        # Rows on the lane axis: (in_feat, groups, 128), row r at (r // 128, r % 128).
        rows_p = max(ROW_ALIGN, _round_up(rows, ROW_ALIGN))
        groups = rows_p // LANES                       # multiple of 8
        x_pad = jnp.pad(x2, ((0, rows_p - rows), (0, 0)))
        x3 = x_pad.T.reshape(in_feat, groups, LANES)   # one fused XLA transpose

        # Row tile: large blocks for HBM efficiency; >= 2 grid steps once the
        # batch is non-trivial so both v7x TensorCores get work.
        if groups <= 16:
            gb = groups                                # tiny batch: single block
        else:
            gb = min(MAX_BLOCK_GROUPS, _round_up(pl.cdiv(groups, 2), 8))
        n_steps = pl.cdiv(groups, gb)                  # ragged tail block is fine

        out3 = pl.pallas_call(
            kernel,
            out_shape=jax.ShapeDtypeStruct((out_feat, groups, LANES), jnp.float32),
            grid_spec=pltpu.PrefetchScalarGridSpec(
                num_scalar_prefetch=2,                 # w_flat, b_flat -> SMEM
                grid=(n_steps,),
                in_specs=[
                    pl.BlockSpec((in_feat, gb, LANES), lambda i, *_: (0, i, 0)),
                ],
                out_specs=pl.BlockSpec((out_feat, gb, LANES), lambda i, *_: (0, i, 0)),
            ),
            compiler_params=pltpu.CompilerParams(
                dimension_semantics=("parallel",)),
        )(w_flat, b_flat, x3)

        out2 = jnp.transpose(out3, (1, 2, 0)).reshape(rows_p, out_feat)[:rows]
        return out2.reshape(*lead_shape, out_feat)

    return forward


def _reference_forward(x, params, layer_sizes, use_shortcut):
    """Pure-JAX reference mirroring the PyTorch forward."""
    for (w, b) in params:
        h = _gelu_tanh(x @ w + b)
        if use_shortcut and x.shape == h.shape:
            x = x + h
        else:
            x = h
    return x


if __name__ == "__main__":
    key = jax.random.PRNGKey(0)
    key, kx = jax.random.split(key)

    # nn.Linear acts on the last dim; layer_sizes[0] == 3, so valid input is
    # (..., 3).  Small (batch, seq, feat) input consistent with the module.
    x = jax.random.uniform(kx, (2, 3, LAYER_SIZES[0]), jnp.float32)
    params = init_params(key, LAYER_SIZES)

    forward = make_forward(params, LAYER_SIZES, USE_SHORTCUT)
    out = jax.block_until_ready(forward(x))

    ref = _reference_forward(x, params, LAYER_SIZES, USE_SHORTCUT)
    assert out.shape == (2, 3, LAYER_SIZES[-1]), out.shape
    assert jnp.allclose(out, ref, atol=1e-5, rtol=1e-5)

    # Also exercise the multi-grid-step / ragged-tail path.
    key, kx2 = jax.random.split(key)
    x_big = jax.random.uniform(kx2, (16, 257, LAYER_SIZES[0]), jnp.float32)
    out_big = jax.block_until_ready(forward(x_big))
    ref_big = _reference_forward(x_big, params, LAYER_SIZES, USE_SHORTCUT)
    assert out_big.shape == (16, 257, LAYER_SIZES[-1]), out_big.shape
    assert jnp.allclose(out_big, ref_big, atol=1e-5, rtol=1e-5)

    print("KERNEL_OK")
</pallas_src>

<mosaic_0001>
module attributes {stable_mosaic.version = 11 : i64} {
  func.func @_deep_mlp_kernel(%arg0: i32, %arg1: memref<39xf32, #tpu.memory_space<smem>>, %arg2: memref<13xf32, #tpu.memory_space<smem>>, %arg3: memref<3x8x128xf32, #tpu.memory_space<vmem>>, %arg4: memref<1x8x128xf32, #tpu.memory_space<vmem>>) attributes {dimension_semantics = [#tpu.dimension_semantics<parallel>], iteration_bounds = array<i64: 1>, scalar_prefetch = 2 : i64, scratch_operands = 0 : i64, tpu.core_type = #tpu.core_type<tc>, window_params = [{transform_indices = @transform_0, window_bounds = array<i64: 3, 8, 128>}, {transform_indices = @transform_1, window_bounds = array<i64: 1, 8, 128>}]} {
    %c0 = arith.constant 0 : index
    %c0_0 = arith.constant 0 : index
    %c0_1 = arith.constant 0 : index
    %0 = vector.load %arg3[%c0, %c0_0, %c0_1] : memref<3x8x128xf32, #tpu.memory_space<vmem>>, vector<1x8x128xf32>
    %1 = vector.shape_cast %0 : vector<1x8x128xf32> to vector<8x128xf32>
    %c1 = arith.constant 1 : index
    %c0_2 = arith.constant 0 : index
    %c0_3 = arith.constant 0 : index
    %2 = vector.load %arg3[%c1, %c0_2, %c0_3] : memref<3x8x128xf32, #tpu.memory_space<vmem>>, vector<1x8x128xf32>
    %3 = vector.shape_cast %2 : vector<1x8x128xf32> to vector<8x128xf32>
    %c2 = arith.constant 2 : index
    %c0_4 = arith.constant 0 : index
    %c0_5 = arith.constant 0 : index
    %4 = vector.load %arg3[%c2, %c0_4, %c0_5] : memref<3x8x128xf32, #tpu.memory_space<vmem>>, vector<1x8x128xf32>
    %5 = vector.shape_cast %4 : vector<1x8x128xf32> to vector<8x128xf32>
    %c0_6 = arith.constant 0 : index
    %6 = memref.load %arg1[%c0_6] : memref<39xf32, #tpu.memory_space<smem>>
    %7 = vector.broadcast %6 : f32 to vector<8x128xf32>
    %8 = arith.mulf %1, %7 : vector<8x128xf32>
    %c3 = arith.constant 3 : index
    %9 = memref.load %arg1[%c3] : memref<39xf32, #tpu.memory_space<smem>>
    %10 = vector.broadcast %9 : f32 to vector<8x128xf32>
    %11 = arith.mulf %3, %10 : vector<8x128xf32>
    %12 = arith.addf %8, %11 : vector<8x128xf32>
    %c6 = arith.constant 6 : index
    %13 = memref.load %arg1[%c6] : memref<39xf32, #tpu.memory_space<smem>>
    %14 = vector.broadcast %13 : f32 to vector<8x128xf32>
    %15 = arith.mulf %5, %14 : vector<8x128xf32>
    %16 = arith.addf %12, %15 : vector<8x128xf32>
    %c0_7 = arith.constant 0 : index
    %17 = memref.load %arg2[%c0_7] : memref<13xf32, #tpu.memory_space<smem>>
    %18 = vector.broadcast %17 : f32 to vector<8x128xf32>
    %19 = arith.addf %16, %18 : vector<8x128xf32>
    %cst = arith.constant 5.000000e-01 : f32
    %20 = vector.broadcast %cst : f32 to vector<8x128xf32>
    %21 = arith.mulf %20, %19 : vector<8x128xf32>
    %22 = arith.mulf %19, %19 : vector<8x128xf32>
    %23 = arith.mulf %22, %19 : vector<8x128xf32>
    %cst_8 = arith.constant 4.471500e-02 : f32
    %24 = vector.broadcast %cst_8 : f32 to vector<8x128xf32>
    %25 = arith.mulf %24, %23 : vector<8x128xf32>
    %26 = arith.addf %19, %25 : vector<8x128xf32>
    %cst_9 = arith.constant 0.797884583 : f32
    %27 = vector.broadcast %cst_9 : f32 to vector<8x128xf32>
    %28 = arith.mulf %27, %26 : vector<8x128xf32>
    %29 = math.tanh %28 : vector<8x128xf32>
    %cst_10 = arith.constant 1.000000e+00 : f32
    %30 = vector.broadcast %cst_10 : f32 to vector<8x128xf32>
    %31 = arith.addf %30, %29 : vector<8x128xf32>
    %32 = arith.mulf %21, %31 : vector<8x128xf32>
    %33 = arith.addf %1, %32 : vector<8x128xf32>
    %c1_11 = arith.constant 1 : index
    %34 = memref.load %arg1[%c1_11] : memref<39xf32, #tpu.memory_space<smem>>
    %35 = vector.broadcast %34 : f32 to vector<8x128xf32>
    %36 = arith.mulf %1, %35 : vector<8x128xf32>
    %c4 = arith.constant 4 : index
    %37 = memref.load %arg1[%c4] : memref<39xf32, #tpu.memory_space<smem>>
    %38 = vector.broadcast %37 : f32 to vector<8x128xf32>
    %39 = arith.mulf %3, %38 : vector<8x128xf32>
    %40 = arith.addf %36, %39 : vector<8x128xf32>
    %c7 = arith.constant 7 : index
    %41 = memref.load %arg1[%c7] : memref<39xf32, #tpu.memory_space<smem>>
    %42 = vector.broadcast %41 : f32 to vector<8x128xf32>
    %43 = arith.mulf %5, %42 : vector<8x128xf32>
    %44 = arith.addf %40, %43 : vector<8x128xf32>
    %c1_12 = arith.constant 1 : index
    %45 = memref.load %arg2[%c1_12] : memref<13xf32, #tpu.memory_space<smem>>
    %46 = vector.broadcast %45 : f32 to vector<8x128xf32>
    %47 = arith.addf %44, %46 : vector<8x128xf32>
    %cst_13 = arith.constant 5.000000e-01 : f32
    %48 = vector.broadcast %cst_13 : f32 to vector<8x128xf32>
    %49 = arith.mulf %48, %47 : vector<8x128xf32>
    %50 = arith.mulf %47, %47 : vector<8x128xf32>
    %51 = arith.mulf %50, %47 : vector<8x128xf32>
    %cst_14 = arith.constant 4.471500e-02 : f32
    %52 = vector.broadcast %cst_14 : f32 to vector<8x128xf32>
    %53 = arith.mulf %52, %51 : vector<8x128xf32>
    %54 = arith.addf %47, %53 : vector<8x128xf32>
    %cst_15 = arith.constant 0.797884583 : f32
    %55 = vector.broadcast %cst_15 : f32 to vector<8x128xf32>
    %56 = arith.mulf %55, %54 : vector<8x128xf32>
    %57 = math.tanh %56 : vector<8x128xf32>
    %cst_16 = arith.constant 1.000000e+00 : f32
    %58 = vector.broadcast %cst_16 : f32 to vector<8x128xf32>
    %59 = arith.addf %58, %57 : vector<8x128xf32>
    %60 = arith.mulf %49, %59 : vector<8x128xf32>
    %61 = arith.addf %3, %60 : vector<8x128xf32>
    %c2_17 = arith.constant 2 : index
    %62 = memref.load %arg1[%c2_17] : memref<39xf32, #tpu.memory_space<smem>>
    %63 = vector.broadcast %62 : f32 to vector<8x128xf32>
    %64 = arith.mulf %1, %63 : vector<8x128xf32>
    %c5 = arith.constant 5 : index
    %65 = memref.load %arg1[%c5] : memref<39xf32, #tpu.memory_space<smem>>
    %66 = vector.broadcast %65 : f32 to vector<8x128xf32>
    %67 = arith.mulf %3, %66 : vector<8x128xf32>
    %68 = arith.addf %64, %67 : vector<8x128xf32>
    %c8 = arith.constant 8 : index
    %69 = memref.load %arg1[%c8] : memref<39xf32, #tpu.memory_space<smem>>
    %70 = vector.broadcast %69 : f32 to vector<8x128xf32>
    %71 = arith.mulf %5, %70 : vector<8x128xf32>
    %72 = arith.addf %68, %71 : vector<8x128xf32>
    %c2_18 = arith.constant 2 : index
    %73 = memref.load %arg2[%c2_18] : memref<13xf32, #tpu.memory_space<smem>>
    %74 = vector.broadcast %73 : f32 to vector<8x128xf32>
    %75 = arith.addf %72, %74 : vector<8x128xf32>
    %cst_19 = arith.constant 5.000000e-01 : f32
    %76 = vector.broadcast %cst_19 : f32 to vector<8x128xf32>
    %77 = arith.mulf %76, %75 : vector<8x128xf32>
    %78 = arith.mulf %75, %75 : vector<8x128xf32>
    %79 = arith.mulf %78, %75 : vector<8x128xf32>
    %cst_20 = arith.constant 4.471500e-02 : f32
    %80 = vector.broadcast %cst_20 : f32 to vector<8x128xf32>
    %81 = arith.mulf %80, %79 : vector<8x128xf32>
    %82 = arith.addf %75, %81 : vector<8x128xf32>
    %cst_21 = arith.constant 0.797884583 : f32
    %83 = vector.broadcast %cst_21 : f32 to vector<8x128xf32>
    %84 = arith.mulf %83, %82 : vector<8x128xf32>
    %85 = math.tanh %84 : vector<8x128xf32>
    %cst_22 = arith.constant 1.000000e+00 : f32
    %86 = vector.broadcast %cst_22 : f32 to vector<8x128xf32>
    %87 = arith.addf %86, %85 : vector<8x128xf32>
    %88 = arith.mulf %77, %87 : vector<8x128xf32>
    %89 = arith.addf %5, %88 : vector<8x128xf32>
    %c9 = arith.constant 9 : index
    %90 = memref.load %arg1[%c9] : memref<39xf32, #tpu.memory_space<smem>>
    %91 = vector.broadcast %90 : f32 to vector<8x128xf32>
    %92 = arith.mulf %33, %91 : vector<8x128xf32>
    %c12 = arith.constant 12 : index
    %93 = memref.load %arg1[%c12] : memref<39xf32, #tpu.memory_space<smem>>
    %94 = vector.broadcast %93 : f32 to vector<8x128xf32>
    %95 = arith.mulf %61, %94 : vector<8x128xf32>
    %96 = arith.addf %92, %95 : vector<8x128xf32>
    %c15 = arith.constant 15 : index
    %97 = memref.load %arg1[%c15] : memref<39xf32, #tpu.memory_space<smem>>
    %98 = vector.broadcast %97 : f32 to vector<8x128xf32>
    %99 = arith.mulf %89, %98 : vector<8x128xf32>
    %100 = arith.addf %96, %99 : vector<8x128xf32>
    %c3_23 = arith.constant 3 : index
    %101 = memref.load %arg2[%c3_23] : memref<13xf32, #tpu.memory_space<smem>>
    %102 = vector.broadcast %101 : f32 to vector<8x128xf32>
    %103 = arith.addf %100, %102 : vector<8x128xf32>
    %cst_24 = arith.constant 5.000000e-01 : f32
    %104 = vector.broadcast %cst_24 : f32 to vector<8x128xf32>
    %105 = arith.mulf %104, %103 : vector<8x128xf32>
    %106 = arith.mulf %103, %103 : vector<8x128xf32>
    %107 = arith.mulf %106, %103 : vector<8x128xf32>
    %cst_25 = arith.constant 4.471500e-02 : f32
    %108 = vector.broadcast %cst_25 : f32 to vector<8x128xf32>
    %109 = arith.mulf %108, %107 : vector<8x128xf32>
    %110 = arith.addf %103, %109 : vector<8x128xf32>
    %cst_26 = arith.constant 0.797884583 : f32
    %111 = vector.broadcast %cst_26 : f32 to vector<8x128xf32>
    %112 = arith.mulf %111, %110 : vector<8x128xf32>
    %113 = math.tanh %112 : vector<8x128xf32>
    %cst_27 = arith.constant 1.000000e+00 : f32
    %114 = vector.broadcast %cst_27 : f32 to vector<8x128xf32>
    %115 = arith.addf %114, %113 : vector<8x128xf32>
    %116 = arith.mulf %105, %115 : vector<8x128xf32>
    %117 = arith.addf %33, %116 : vector<8x128xf32>
    %c10 = arith.constant 10 : index
    %118 = memref.load %arg1[%c10] : memref<39xf32, #tpu.memory_space<smem>>
    %119 = vector.broadcast %118 : f32 to vector<8x128xf32>
    %120 = arith.mulf %33, %119 : vector<8x128xf32>
    %c13 = arith.constant 13 : index
    %121 = memref.load %arg1[%c13] : memref<39xf32, #tpu.memory_space<smem>>
    %122 = vector.broadcast %121 : f32 to vector<8x128xf32>
    %123 = arith.mulf %61, %122 : vector<8x128xf32>
    %124 = arith.addf %120, %123 : vector<8x128xf32>
    %c16 = arith.constant 16 : index
    %125 = memref.load %arg1[%c16] : memref<39xf32, #tpu.memory_space<smem>>
    %126 = vector.broadcast %125 : f32 to vector<8x128xf32>
    %127 = arith.mulf %89, %126 : vector<8x128xf32>
    %128 = arith.addf %124, %127 : vector<8x128xf32>
    %c4_28 = arith.constant 4 : index
    %129 = memref.load %arg2[%c4_28] : memref<13xf32, #tpu.memory_space<smem>>
    %130 = vector.broadcast %129 : f32 to vector<8x128xf32>
    %131 = arith.addf %128, %130 : vector<8x128xf32>
    %cst_29 = arith.constant 5.000000e-01 : f32
    %132 = vector.broadcast %cst_29 : f32 to vector<8x128xf32>
    %133 = arith.mulf %132, %131 : vector<8x128xf32>
    %134 = arith.mulf %131, %131 : vector<8x128xf32>
    %135 = arith.mulf %134, %131 : vector<8x128xf32>
    %cst_30 = arith.constant 4.471500e-02 : f32
    %136 = vector.broadcast %cst_30 : f32 to vector<8x128xf32>
    %137 = arith.mulf %136, %135 : vector<8x128xf32>
    %138 = arith.addf %131, %137 : vector<8x128xf32>
    %cst_31 = arith.constant 0.797884583 : f32
    %139 = vector.broadcast %cst_31 : f32 to vector<8x128xf32>
    %140 = arith.mulf %139, %138 : vector<8x128xf32>
    %141 = math.tanh %140 : vector<8x128xf32>
    %cst_32 = arith.constant 1.000000e+00 : f32
    %142 = vector.broadcast %cst_32 : f32 to vector<8x128xf32>
    %143 = arith.addf %142, %141 : vector<8x128xf32>
    %144 = arith.mulf %133, %143 : vector<8x128xf32>
    %145 = arith.addf %61, %144 : vector<8x128xf32>
    %c11 = arith.constant 11 : index
    %146 = memref.load %arg1[%c11] : memref<39xf32, #tpu.memory_space<smem>>
    %147 = vector.broadcast %146 : f32 to vector<8x128xf32>
    %148 = arith.mulf %33, %147 : vector<8x128xf32>
    %c14 = arith.constant 14 : index
    %149 = memref.load %arg1[%c14] : memref<39xf32, #tpu.memory_space<smem>>
    %150 = vector.broadcast %149 : f32 to vector<8x128xf32>
    %151 = arith.mulf %61, %150 : vector<8x128xf32>
    %152 = arith.addf %148, %151 : vector<8x128xf32>
    %c17 = arith.constant 17 : index
    %153 = memref.load %arg1[%c17] : memref<39xf32, #tpu.memory_space<smem>>
    %154 = vector.broadcast %153 : f32 to vector<8x128xf32>
    %155 = arith.mulf %89, %154 : vector<8x128xf32>
    %156 = arith.addf %152, %155 : vector<8x128xf32>
    %c5_33 = arith.constant 5 : index
    %157 = memref.load %arg2[%c5_33] : memref<13xf32, #tpu.memory_space<smem>>
    %158 = vector.broadcast %157 : f32 to vector<8x128xf32>
    %159 = arith.addf %156, %158 : vector<8x128xf32>
    %cst_34 = arith.constant 5.000000e-01 : f32
    %160 = vector.broadcast %cst_34 : f32 to vector<8x128xf32>
    %161 = arith.mulf %160, %159 : vector<8x128xf32>
    %162 = arith.mulf %159, %159 : vector<8x128xf32>
    %163 = arith.mulf %162, %159 : vector<8x128xf32>
    %cst_35 = arith.constant 4.471500e-02 : f32
    %164 = vector.broadcast %cst_35 : f32 to vector<8x128xf32>
    %165 = arith.mulf %164, %163 : vector<8x128xf32>
    %166 = arith.addf %159, %165 : vector<8x128xf32>
    %cst_36 = arith.constant 0.797884583 : f32
    %167 = vector.broadcast %cst_36 : f32 to vector<8x128xf32>
    %168 = arith.mulf %167, %166 : vector<8x128xf32>
    %169 = math.tanh %168 : vector<8x128xf32>
    %cst_37 = arith.constant 1.000000e+00 : f32
    %170 = vector.broadcast %cst_37 : f32 to vector<8x128xf32>
    %171 = arith.addf %170, %169 : vector<8x128xf32>
    %172 = arith.mulf %161, %171 : vector<8x128xf32>
    %173 = arith.addf %89, %172 : vector<8x128xf32>
    %c18 = arith.constant 18 : index
    %174 = memref.load %arg1[%c18] : memref<39xf32, #tpu.memory_space<smem>>
    %175 = vector.broadcast %174 : f32 to vector<8x128xf32>
    %176 = arith.mulf %117, %175 : vector<8x128xf32>
    %c21 = arith.constant 21 : index
    %177 = memref.load %arg1[%c21] : memref<39xf32, #tpu.memory_space<smem>>
    %178 = vector.broadcast %177 : f32 to vector<8x128xf32>
    %179 = arith.mulf %145, %178 : vector<8x128xf32>
    %180 = arith.addf %176, %179 : vector<8x128xf32>
    %c24 = arith.constant 24 : index
    %181 = memref.load %arg1[%c24] : memref<39xf32, #tpu.memory_space<smem>>
    %182 = vector.broadcast %181 : f32 to vector<8x128xf32>
    %183 = arith.mulf %173, %182 : vector<8x128xf32>
    %184 = arith.addf %180, %183 : vector<8x128xf32>
    %c6_38 = arith.constant 6 : index
    %185 = memref.load %arg2[%c6_38] : memref<13xf32, #tpu.memory_space<smem>>
    %186 = vector.broadcast %185 : f32 to vector<8x128xf32>
    %187 = arith.addf %184, %186 : vector<8x128xf32>
    %cst_39 = arith.constant 5.000000e-01 : f32
    %188 = vector.broadcast %cst_39 : f32 to vector<8x128xf32>
    %189 = arith.mulf %188, %187 : vector<8x128xf32>
    %190 = arith.mulf %187, %187 : vector<8x128xf32>
    %191 = arith.mulf %190, %187 : vector<8x128xf32>
    %cst_40 = arith.constant 4.471500e-02 : f32
    %192 = vector.broadcast %cst_40 : f32 to vector<8x128xf32>
    %193 = arith.mulf %192, %191 : vector<8x128xf32>
    %194 = arith.addf %187, %193 : vector<8x128xf32>
    %cst_41 = arith.constant 0.797884583 : f32
    %195 = vector.broadcast %cst_41 : f32 to vector<8x128xf32>
    %196 = arith.mulf %195, %194 : vector<8x128xf32>
    %197 = math.tanh %196 : vector<8x128xf32>
    %cst_42 = arith.constant 1.000000e+00 : f32
    %198 = vector.broadcast %cst_42 : f32 to vector<8x128xf32>
    %199 = arith.addf %198, %197 : vector<8x128xf32>
    %200 = arith.mulf %189, %199 : vector<8x128xf32>
    %201 = arith.addf %117, %200 : vector<8x128xf32>
    %c19 = arith.constant 19 : index
    %202 = memref.load %arg1[%c19] : memref<39xf32, #tpu.memory_space<smem>>
    %203 = vector.broadcast %202 : f32 to vector<8x128xf32>
    %204 = arith.mulf %117, %203 : vector<8x128xf32>
    %c22 = arith.constant 22 : index
    %205 = memref.load %arg1[%c22] : memref<39xf32, #tpu.memory_space<smem>>
    %206 = vector.broadcast %205 : f32 to vector<8x128xf32>
    %207 = arith.mulf %145, %206 : vector<8x128xf32>
    %208 = arith.addf %204, %207 : vector<8x128xf32>
    %c25 = arith.constant 25 : index
    %209 = memref.load %arg1[%c25] : memref<39xf32, #tpu.memory_space<smem>>
    %210 = vector.broadcast %209 : f32 to vector<8x128xf32>
    %211 = arith.mulf %173, %210 : vector<8x128xf32>
    %212 = arith.addf %208, %211 : vector<8x128xf32>
    %c7_43 = arith.constant 7 : index
    %213 = memref.load %arg2[%c7_43] : memref<13xf32, #tpu.memory_space<smem>>
    %214 = vector.broadcast %213 : f32 to vector<8x128xf32>
    %215 = arith.addf %212, %214 : vector<8x128xf32>
    %cst_44 = arith.constant 5.000000e-01 : f32
    %216 = vector.broadcast %cst_44 : f32 to vector<8x128xf32>
    %217 = arith.mulf %216, %215 : vector<8x128xf32>
    %218 = arith.mulf %215, %215 : vector<8x128xf32>
    %219 = arith.mulf %218, %215 : vector<8x128xf32>
    %cst_45 = arith.constant 4.471500e-02 : f32
    %220 = vector.broadcast %cst_45 : f32 to vector<8x128xf32>
    %221 = arith.mulf %220, %219 : vector<8x128xf32>
    %222 = arith.addf %215, %221 : vector<8x128xf32>
    %cst_46 = arith.constant 0.797884583 : f32
    %223 = vector.broadcast %cst_46 : f32 to vector<8x128xf32>
    %224 = arith.mulf %223, %222 : vector<8x128xf32>
    %225 = math.tanh %224 : vector<8x128xf32>
    %cst_47 = arith.constant 1.000000e+00 : f32
    %226 = vector.broadcast %cst_47 : f32 to vector<8x128xf32>
    %227 = arith.addf %226, %225 : vector<8x128xf32>
    %228 = arith.mulf %217, %227 : vector<8x128xf32>
    %229 = arith.addf %145, %228 : vector<8x128xf32>
    %c20 = arith.constant 20 : index
    %230 = memref.load %arg1[%c20] : memref<39xf32, #tpu.memory_space<smem>>
    %231 = vector.broadcast %230 : f32 to vector<8x128xf32>
    %232 = arith.mulf %117, %231 : vector<8x128xf32>
    %c23 = arith.constant 23 : index
    %233 = memref.load %arg1[%c23] : memref<39xf32, #tpu.memory_space<smem>>
    %234 = vector.broadcast %233 : f32 to vector<8x128xf32>
    %235 = arith.mulf %145, %234 : vector<8x128xf32>
    %236 = arith.addf %232, %235 : vector<8x128xf32>
    %c26 = arith.constant 26 : index
    %237 = memref.load %arg1[%c26] : memref<39xf32, #tpu.memory_space<smem>>
    %238 = vector.broadcast %237 : f32 to vector<8x128xf32>
    %239 = arith.mulf %173, %238 : vector<8x128xf32>
    %240 = arith.addf %236, %239 : vector<8x128xf32>
    %c8_48 = arith.constant 8 : index
    %241 = memref.load %arg2[%c8_48] : memref<13xf32, #tpu.memory_space<smem>>
    %242 = vector.broadcast %241 : f32 to vector<8x128xf32>
    %243 = arith.addf %240, %242 : vector<8x128xf32>
    %cst_49 = arith.constant 5.000000e-01 : f32
    %244 = vector.broadcast %cst_49 : f32 to vector<8x128xf32>
    %245 = arith.mulf %244, %243 : vector<8x128xf32>
    %246 = arith.mulf %243, %243 : vector<8x128xf32>
    %247 = arith.mulf %246, %243 : vector<8x128xf32>
    %cst_50 = arith.constant 4.471500e-02 : f32
    %248 = vector.broadcast %cst_50 : f32 to vector<8x128xf32>
    %249 = arith.mulf %248, %247 : vector<8x128xf32>
    %250 = arith.addf %243, %249 : vector<8x128xf32>
    %cst_51 = arith.constant 0.797884583 : f32
    %251 = vector.broadcast %cst_51 : f32 to vector<8x128xf32>
    %252 = arith.mulf %251, %250 : vector<8x128xf32>
    %253 = math.tanh %252 : vector<8x128xf32>
    %cst_52 = arith.constant 1.000000e+00 : f32
    %254 = vector.broadcast %cst_52 : f32 to vector<8x128xf32>
    %255 = arith.addf %254, %253 : vector<8x128xf32>
    %256 = arith.mulf %245, %255 : vector<8x128xf32>
    %257 = arith.addf %173, %256 : vector<8x128xf32>
    %c27 = arith.constant 27 : index
    %258 = memref.load %arg1[%c27] : memref<39xf32, #tpu.memory_space<smem>>
    %259 = vector.broadcast %258 : f32 to vector<8x128xf32>
    %260 = arith.mulf %201, %259 : vector<8x128xf32>
    %c30 = arith.constant 30 : index
    %261 = memref.load %arg1[%c30] : memref<39xf32, #tpu.memory_space<smem>>
    %262 = vector.broadcast %261 : f32 to vector<8x128xf32>
    %263 = arith.mulf %229, %262 : vector<8x128xf32>
    %264 = arith.addf %260, %263 : vector<8x128xf32>
    %c33 = arith.constant 33 : index
    %265 = memref.load %arg1[%c33] : memref<39xf32, #tpu.memory_space<smem>>
    %266 = vector.broadcast %265 : f32 to vector<8x128xf32>
    %267 = arith.mulf %257, %266 : vector<8x128xf32>
    %268 = arith.addf %264, %267 : vector<8x128xf32>
    %c9_53 = arith.constant 9 : index
    %269 = memref.load %arg2[%c9_53] : memref<13xf32, #tpu.memory_space<smem>>
    %270 = vector.broadcast %269 : f32 to vector<8x128xf32>
    %271 = arith.addf %268, %270 : vector<8x128xf32>
    %cst_54 = arith.constant 5.000000e-01 : f32
    %272 = vector.broadcast %cst_54 : f32 to vector<8x128xf32>
    %273 = arith.mulf %272, %271 : vector<8x128xf32>
    %274 = arith.mulf %271, %271 : vector<8x128xf32>
    %275 = arith.mulf %274, %271 : vector<8x128xf32>
    %cst_55 = arith.constant 4.471500e-02 : f32
    %276 = vector.broadcast %cst_55 : f32 to vector<8x128xf32>
    %277 = arith.mulf %276, %275 : vector<8x128xf32>
    %278 = arith.addf %271, %277 : vector<8x128xf32>
    %cst_56 = arith.constant 0.797884583 : f32
    %279 = vector.broadcast %cst_56 : f32 to vector<8x128xf32>
    %280 = arith.mulf %279, %278 : vector<8x128xf32>
    %281 = math.tanh %280 : vector<8x128xf32>
    %cst_57 = arith.constant 1.000000e+00 : f32
    %282 = vector.broadcast %cst_57 : f32 to vector<8x128xf32>
    %283 = arith.addf %282, %281 : vector<8x128xf32>
    %284 = arith.mulf %273, %283 : vector<8x128xf32>
    %285 = arith.addf %201, %284 : vector<8x128xf32>
    %c28 = arith.constant 28 : index
    %286 = memref.load %arg1[%c28] : memref<39xf32, #tpu.memory_space<smem>>
    %287 = vector.broadcast %286 : f32 to vector<8x128xf32>
    %288 = arith.mulf %201, %287 : vector<8x128xf32>
    %c31 = arith.constant 31 : index
    %289 = memref.load %arg1[%c31] : memref<39xf32, #tpu.memory_space<smem>>
    %290 = vector.broadcast %289 : f32 to vector<8x128xf32>
    %291 = arith.mulf %229, %290 : vector<8x128xf32>
    %292 = arith.addf %288, %291 : vector<8x128xf32>
    %c34 = arith.constant 34 : index
    %293 = memref.load %arg1[%c34] : memref<39xf32, #tpu.memory_space<smem>>
    %294 = vector.broadcast %293 : f32 to vector<8x128xf32>
    %295 = arith.mulf %257, %294 : vector<8x128xf32>
    %296 = arith.addf %292, %295 : vector<8x128xf32>
    %c10_58 = arith.constant 10 : index
    %297 = memref.load %arg2[%c10_58] : memref<13xf32, #tpu.memory_space<smem>>
    %298 = vector.broadcast %297 : f32 to vector<8x128xf32>
    %299 = arith.addf %296, %298 : vector<8x128xf32>
    %cst_59 = arith.constant 5.000000e-01 : f32
    %300 = vector.broadcast %cst_59 : f32 to vector<8x128xf32>
    %301 = arith.mulf %300, %299 : vector<8x128xf32>
    %302 = arith.mulf %299, %299 : vector<8x128xf32>
    %303 = arith.mulf %302, %299 : vector<8x128xf32>
    %cst_60 = arith.constant 4.471500e-02 : f32
    %304 = vector.broadcast %cst_60 : f32 to vector<8x128xf32>
    %305 = arith.mulf %304, %303 : vector<8x128xf32>
    %306 = arith.addf %299, %305 : vector<8x128xf32>
    %cst_61 = arith.constant 0.797884583 : f32
    %307 = vector.broadcast %cst_61 : f32 to vector<8x128xf32>
    %308 = arith.mulf %307, %306 : vector<8x128xf32>
    %309 = math.tanh %308 : vector<8x128xf32>
    %cst_62 = arith.constant 1.000000e+00 : f32
    %310 = vector.broadcast %cst_62 : f32 to vector<8x128xf32>
    %311 = arith.addf %310, %309 : vector<8x128xf32>
    %312 = arith.mulf %301, %311 : vector<8x128xf32>
    %313 = arith.addf %229, %312 : vector<8x128xf32>
    %c29 = arith.constant 29 : index
    %314 = memref.load %arg1[%c29] : memref<39xf32, #tpu.memory_space<smem>>
    %315 = vector.broadcast %314 : f32 to vector<8x128xf32>
    %316 = arith.mulf %201, %315 : vector<8x128xf32>
    %c32 = arith.constant 32 : index
    %317 = memref.load %arg1[%c32] : memref<39xf32, #tpu.memory_space<smem>>
    %318 = vector.broadcast %317 : f32 to vector<8x128xf32>
    %319 = arith.mulf %229, %318 : vector<8x128xf32>
    %320 = arith.addf %316, %319 : vector<8x128xf32>
    %c35 = arith.constant 35 : index
    %321 = memref.load %arg1[%c35] : memref<39xf32, #tpu.memory_space<smem>>
    %322 = vector.broadcast %321 : f32 to vector<8x128xf32>
    %323 = arith.mulf %257, %322 : vector<8x128xf32>
    %324 = arith.addf %320, %323 : vector<8x128xf32>
    %c11_63 = arith.constant 11 : index
    %325 = memref.load %arg2[%c11_63] : memref<13xf32, #tpu.memory_space<smem>>
    %326 = vector.broadcast %325 : f32 to vector<8x128xf32>
    %327 = arith.addf %324, %326 : vector<8x128xf32>
    %cst_64 = arith.constant 5.000000e-01 : f32
    %328 = vector.broadcast %cst_64 : f32 to vector<8x128xf32>
    %329 = arith.mulf %328, %327 : vector<8x128xf32>
    %330 = arith.mulf %327, %327 : vector<8x128xf32>
    %331 = arith.mulf %330, %327 : vector<8x128xf32>
    %cst_65 = arith.constant 4.471500e-02 : f32
    %332 = vector.broadcast %cst_65 : f32 to vector<8x128xf32>
    %333 = arith.mulf %332, %331 : vector<8x128xf32>
    %334 = arith.addf %327, %333 : vector<8x128xf32>
    %cst_66 = arith.constant 0.797884583 : f32
    %335 = vector.broadcast %cst_66 : f32 to vector<8x128xf32>
    %336 = arith.mulf %335, %334 : vector<8x128xf32>
    %337 = math.tanh %336 : vector<8x128xf32>
    %cst_67 = arith.constant 1.000000e+00 : f32
    %338 = vector.broadcast %cst_67 : f32 to vector<8x128xf32>
    %339 = arith.addf %338, %337 : vector<8x128xf32>
    %340 = arith.mulf %329, %339 : vector<8x128xf32>
    %341 = arith.addf %257, %340 : vector<8x128xf32>
    %c36 = arith.constant 36 : index
    %342 = memref.load %arg1[%c36] : memref<39xf32, #tpu.memory_space<smem>>
    %343 = vector.broadcast %342 : f32 to vector<8x128xf32>
    %344 = arith.mulf %285, %343 : vector<8x128xf32>
    %c37 = arith.constant 37 : index
    %345 = memref.load %arg1[%c37] : memref<39xf32, #tpu.memory_space<smem>>
    %346 = vector.broadcast %345 : f32 to vector<8x128xf32>
    %347 = arith.mulf %313, %346 : vector<8x128xf32>
    %348 = arith.addf %344, %347 : vector<8x128xf32>
    %c38 = arith.constant 38 : index
    %349 = memref.load %arg1[%c38] : memref<39xf32, #tpu.memory_space<smem>>
    %350 = vector.broadcast %349 : f32 to vector<8x128xf32>
    %351 = arith.mulf %341, %350 : vector<8x128xf32>
    %352 = arith.addf %348, %351 : vector<8x128xf32>
    %c12_68 = arith.constant 12 : index
    %353 = memref.load %arg2[%c12_68] : memref<13xf32, #tpu.memory_space<smem>>
    %354 = vector.broadcast %353 : f32 to vector<8x128xf32>
    %355 = arith.addf %352, %354 : vector<8x128xf32>
    %cst_69 = arith.constant 5.000000e-01 : f32
    %356 = vector.broadcast %cst_69 : f32 to vector<8x128xf32>
    %357 = arith.mulf %356, %355 : vector<8x128xf32>
    %358 = arith.mulf %355, %355 : vector<8x128xf32>
    %359 = arith.mulf %358, %355 : vector<8x128xf32>
    %cst_70 = arith.constant 4.471500e-02 : f32
    %360 = vector.broadcast %cst_70 : f32 to vector<8x128xf32>
    %361 = arith.mulf %360, %359 : vector<8x128xf32>
    %362 = arith.addf %355, %361 : vector<8x128xf32>
    %cst_71 = arith.constant 0.797884583 : f32
    %363 = vector.broadcast %cst_71 : f32 to vector<8x128xf32>
    %364 = arith.mulf %363, %362 : vector<8x128xf32>
    %365 = math.tanh %364 : vector<8x128xf32>
    %cst_72 = arith.constant 1.000000e+00 : f32
    %366 = vector.broadcast %cst_72 : f32 to vector<8x128xf32>
    %367 = arith.addf %366, %365 : vector<8x128xf32>
    %368 = arith.mulf %357, %367 : vector<8x128xf32>
    %c0_73 = arith.constant 0 : index
    %c0_74 = arith.constant 0 : index
    %c0_75 = arith.constant 0 : index
    %369 = vector.load %arg4[%c0_73, %c0_74, %c0_75] : memref<1x8x128xf32, #tpu.memory_space<vmem>>, vector<1x8x128xf32>
    %370 = vector.shape_cast %369 : vector<1x8x128xf32> to vector<8x128xf32>
    %371 = vector.shape_cast %368 : vector<8x128xf32> to vector<1x8x128xf32>
    tpu.vector_store %arg4[%c0_73, %c0_74, %c0_75], %371 {strides = array<i32>} : memref<1x8x128xf32, #tpu.memory_space<vmem>>, vector<1x8x128xf32>,
    return
  }
  func.func @transform_0(%arg0: i32, %arg1: memref<39xf32, #tpu.memory_space<smem>>, %arg2: memref<13xf32, #tpu.memory_space<smem>>) -> (i32, i32, i32) {
    %c0_i32 = arith.constant 0 : i32
    %c0_i32_0 = arith.constant 0 : i32
    %c0_i32_1 = arith.constant 0 : i32
    return %c0_i32, %arg0, %c0_i32_0 : i32, i32, i32
  }
  func.func @transform_1(%arg0: i32, %arg1: memref<39xf32, #tpu.memory_space<smem>>, %arg2: memref<13xf32, #tpu.memory_space<smem>>) -> (i32, i32, i32) {
    %c0_i32 = arith.constant 0 : i32
    %c0_i32_0 = arith.constant 0 : i32
    %c0_i32_1 = arith.constant 0 : i32
    return %c0_i32, %arg0, %c0_i32_0 : i32, i32, i32
  }
}

</mosaic_0001>

<bundles_post_ra>
// kernel: forward.1
= control target key start
LH: loop header
LB: loop body
LE: loop exit
PB: predicated region body
PF: predicated region fallthrough
CT: control target
= control target key end

     0   :  { %s646_s0 = inlined_call_operand.vmem [shape: f32[39], index: 0, kind: input, shape index: {}]   ;;  %s647_s2 = inlined_call_operand.vmem [shape: f32[3,8,128], index: 2, kind: input, shape index: {}]   ;;  %s648_s3 = inlined_call_operand.vmem [shape: f32[1,8,128], index: 3, kind: output, shape index: {}]   ;;  %s649_s1 = inlined_call_operand.vmem [shape: f32[13], index: 1, kind: input, shape index: {}]  }
   0x1   :  { %s8_s14 = sshll.u32 %s646_s0, 4  ;;  %s12_s17 = sshll.u32 %s649_s1, 4  ;;  %s9_s14 = int_to_ptr.vmem [resolvable:$true] %s8_s14  ;;  %s13_s17 = int_to_ptr.vmem [resolvable:$true] %s12_s17 }
   0x2   :  { %s421_s18 = scalar_lea.vmem %s9_s14, 16  ;;  %p426_p1 = scmp.lt.s32.totalorder %s9_s14, %s9_s14 }
   0x3   :  { %p422_p0 = scmp.ne.s32.totalorder %s9_s14, %s421_s18  ;;  %p427_p2 = scmp.lt.s32.totalorder %s421_s18, %s421_s18 }
   0x5   :  { %p428_p3 = por %p427_p2, %p426_p1 }
   0x7   :  { %p429_p4 = pnand %p428_p3, %p422_p0 }
   0x9   :  { %432 = shalt.err (!%p429_p4)  }
   0xa   :  { %s447_s19 = smov [#allocation3]   ;;  %s433_s20 = scalar_lea.vmem %s13_s17, 16 }
   0xb   :  { %11 = dma.vmem_to_smem %s9_s14, 16, %s447_s19, [#allocation2] }
   0xc   :  { %p434_p5 = scmp.ne.s32.totalorder %s13_s17, %s433_s20  ;;  %p438_p6 = scmp.lt.s32.totalorder %s13_s17, %s13_s17 }
   0xd   :  { %p439_p7 = scmp.lt.s32.totalorder %s433_s20, %s433_s20 }
   0xf   :  { %p440_p8 = por %p439_p7, %p438_p6 }
  0x11   :  { %p441_p9 = pnand %p440_p8, %p434_p5 }
  0x13   :  { %444 = shalt.err (!%p441_p9)  }
  0x14   :  { %s448_s0 = smov [#allocation4]  }
  0x15   :  { %15 = dma.vmem_to_smem %s13_s17, 16, %s448_s0, [#allocation2] }
  0x16   :  { %445 = dma.done.wait [#allocation2], 32 }
  0x17   :  { %446 = vsyncadd [#allocation2], 4294967264 }
  0x18   :  { %17 = sfence }
  0x19   :  { %s25_s1 = sld [smem:[#allocation3]]  ;;  %v478_v0 = vld [vmem:[%s647_s2] sm:$0xff]  ;;  %v483_v1 = vld [vmem:[%s647_s2 + $0x8] sm:$0xff]  ;;  %v488_v2 = vld [vmem:[%s647_s2 + $0x10] sm:$0xff] }
  0x1a   :  { %s343_s21 = sld [smem:[#allocation3 + $0x3]] }
  0x1b   :  { %s344_s22 = sld [smem:[#allocation3 + $0x6]] }
  0x1c   :  { %s36_s23 = sld [smem:[#allocation4]] }
  0x1d   :  { %s345_s26 = sld [smem:[#allocation3 + $0x1]] }
  0x1e   :  { %s346_s29 = sld [smem:[#allocation3 + $0x4]] }
  0x1f   :  { %v26_v3 = vstv %s25_s1  ;;  %s347_s5 = sld [smem:[#allocation3 + $0x7]] }
  0x20   :  { %v27_v4 = vmul.f32 %v26_v3, %v478_v0  ;;  %v29_v5 = vstv %s343_s21  ;;  %s348_s6 = sld [smem:[#allocation4 + $0x1]] }
  0x21   :  { %v30_v6 = vmul.f32 %v483_v1, %v29_v5  ;;  %v33_v7 = vstv %s344_s22  ;;  %s349_s7 = sld [smem:[#allocation3 + $0x2]] }
  0x22   :  { %v34_v8 = vmul.f32 %v488_v2, %v33_v7  ;;  %s350_s8 = sld [smem:[#allocation3 + $0x5]]  ;;  %v37_v11 = vstv %s36_s23 }
  0x23   :  { %v31_v9 = vadd.f32 %v30_v6, %v27_v4  ;;  %v50_v10 = vstv %s345_s26  ;;  %s351_s9 = sld [smem:[#allocation3 + $0x8]] }
  0x24   :  { %v51_v12 = vmul.f32 %v50_v10, %v478_v0  ;;  %v53_v13 = vstv %s346_s29  ;;  %s352_s2 = sld [smem:[#allocation4 + $0x2]] }
  0x25   :  { %v35_v14 = vadd.f32 %v34_v8, %v31_v9  ;;  %v54_v15 = vmul.f32 %v483_v1, %v53_v13  ;;  %v57_v16 = vstv %s347_s5  ;;  %s353_s10 = sld [smem:[#allocation3 + $0x9]] }
  0x26   :  { %v58_v17 = vmul.f32 %v488_v2, %v57_v16  ;;  %v61_v21 = vstv %s348_s6  ;;  %s499_s11 = sld [smem:[#allocation3 + $0xc]] }
  0x27   :  { %v38_v18 = vadd.f32 %v37_v11, %v35_v14  ;;  %v55_v19 = vadd.f32 %v54_v15, %v51_v12  ;;  %v74_v20 = vstv %s349_s7  ;;  %s357_s12 = sld [smem:[#allocation3 + $0xa]] }
  0x28   :  { %v75_v22 = vmul.f32 %v74_v20, %v478_v0  ;;  %v77_v23 = vstv %s350_s8  ;;  %s361_s13 = sld [smem:[#allocation3 + $0xb]] }
  0x29   :  { %v40_v24 = vmul.f32 %v38_v18, %v38_v18  ;;  %v59_v25 = vadd.f32 %v58_v17, %v55_v19  ;;  %v78_v26 = vmul.f32 %v483_v1, %v77_v23  ;;  %v81_v27 = vstv %s351_s9  ;;  %s501_s14 = sld [smem:[#allocation3 + $0xd]] }
  0x2a   :  { %v82_v31 = vmul.f32 %v488_v2, %v81_v27  ;;  %v85_v32 = vstv %s352_s2  ;;  %v39_v48 = vmul.f32 0.5, %v38_v18  ;;  %s362_s15 = sld [smem:[#allocation3 + $0xe]] }
  0x2b   :  { %v41_v28 = vmul.f32 %v40_v24, %v38_v18  ;;  %v62_v29 = vadd.f32 %v61_v21, %v59_v25  ;;  %v79_v30 = vadd.f32 %v78_v26, %v75_v22  ;;  %s503_s16 = sld [smem:[#allocation3 + $0xf]]  ;;  %v98_v56 = vstv %s353_s10 }
  0x2c   :  { %s505_s17 = sld [smem:[#allocation3 + $0x10]]  ;;  %v101_v63 = vstv %s499_s11 }
  0x2d   :  { %v42_v33 = vmul.f32 0.044715, %v41_v28  ;;  %v64_v34 = vmul.f32 %v62_v29, %v62_v29  ;;  %v83_v35 = vadd.f32 %v82_v31, %v79_v30  ;;  %v63_v52 = vmul.f32 0.5, %v62_v29  ;;  %s507_s18 = sld [smem:[#allocation3 + $0x11]] }
  0x2e   :  { %s512_s19 = sld [smem:[#allocation4 + $0x3]]  ;;  %v122_v57 = vstv %s357_s12  ;;  %v146_v58 = vstv %s361_s13 }
  0x2f   :  { %v43_v36 = vadd.f32 %v42_v33, %v38_v18  ;;  %v65_v37 = vmul.f32 %v64_v34, %v62_v29  ;;  %v86_v38 = vadd.f32 %v85_v32, %v83_v35  ;;  %s514_s20 = sld [smem:[#allocation4 + $0x4]]  ;;  %v125_v3 = vstv %s501_s14 }
  0x30   :  { %s364_s0 = sld [smem:[#allocation4 + $0x5]] }
  0x31   :  { %v44_v39 = vmul.f32 0.7978846, %v43_v36  ;;  %v66_v40 = vmul.f32 0.044715, %v65_v37  ;;  %v88_v41 = vmul.f32 %v86_v38, %v86_v38  ;;  %v87_v60 = vmul.f32 0.5, %v86_v38  ;;  %s538_s1 = sld [smem:[#allocation3 + $0x12]] }
  0x32   :  { %v105_v12 = vstv %s503_s16  ;;  %v129_v13 = vstv %s505_s17  ;;  %s540_s21 = sld [smem:[#allocation3 + $0x15]] }
  0x33   :  { %395 = vtanh.f32 %v44_v39  ;;  %v67_v42 = vadd.f32 %v66_v40, %v62_v29  ;;  %v89_v43 = vmul.f32 %v88_v41, %v86_v38  ;;  %v153_v14 = vstv %s507_s18  ;;  %s542_s22 = sld [smem:[#allocation3 + $0x18]] }
  0x34   :  { %v109_v21 = vstv %s512_s19  ;;  %s544_s23 = sld [smem:[#allocation3 + $0x13]] }
  0x35   :  { %v68_v44 = vmul.f32 0.7978846, %v67_v42  ;;  %v90_v45 = vmul.f32 0.044715, %v89_v43  ;;  %v133_v22 = vstv %s514_s20  ;;  %s546_s24 = sld [smem:[#allocation3 + $0x16]] }
  0x36   :  { %v157_v23 = vstv %s364_s0  ;;  %s548_s25 = sld [smem:[#allocation3 + $0x19]] }
  0x37   :  { %397 = vtanh.f32 %v68_v44  ;;  %v91_v46 = vadd.f32 %v90_v45, %v86_v38  ;;  %s550_s26 = sld [smem:[#allocation3 + $0x14]] }
  0x38   :  { %s552_s27 = sld [smem:[#allocation3 + $0x17]] }
  0x39   :  { %v92_v47 = vmul.f32 0.7978846, %v91_v46  ;;  %s554_s28 = sld [smem:[#allocation3 + $0x1a]] }
  0x3a   :  { %s556_s29 = sld [smem:[#allocation4 + $0x6]] }
  0x3b   :  { %399 = vtanh.f32 %v92_v47  ;;  %s558_s30 = sld [smem:[#allocation4 + $0x7]] }
  0x3c   :  { %s561_s4 = sld [smem:[#allocation4 + $0x8]] }
  0x3d   :  { %s592_s5 = sld [smem:[#allocation3 + $0x1b]] }
  0x3e   :  { %s594_s6 = sld [smem:[#allocation3 + $0x1e]] }
  0x3f   :  { %s596_s7 = sld [smem:[#allocation3 + $0x21]] }
  0x40   :  { %v396_v49 = vpop.eup %395  ;;  %s598_s8 = sld [smem:[#allocation3 + $0x1c]] }
  0x41   :  { %v46_v50 = vadd.f32 1.0, %v396_v49  ;;  %s600_s9 = sld [smem:[#allocation3 + $0x1f]] }
  0x42   :  { %s602_s2 = sld [smem:[#allocation3 + $0x22]] }
  0x43   :  { %v47_v51 = vmul.f32 %v46_v50, %v39_v48  ;;  %s604_s10 = sld [smem:[#allocation3 + $0x1d]] }
  0x44   :  { %v398_v53 = vpop.eup %397  ;;  %s606_s11 = sld [smem:[#allocation3 + $0x20]] }
  0x45   :  { %v510_v54 = vadd.f32 %v47_v51, %v478_v0  ;;  %v70_v55 = vadd.f32 1.0, %v398_v53  ;;  %v149_v0 = vstv %s362_s15  ;;  %s608_s12 = sld [smem:[#allocation3 + $0x23]] }
  0x46   :  { %s610_s13 = sld [smem:[#allocation4 + $0x9]] }
  0x47   :  { %v71_v59 = vmul.f32 %v70_v55, %v63_v52  ;;  %v99_v62 = vmul.f32 %v98_v56, %v510_v54  ;;  %v123_v6 = vmul.f32 %v122_v57, %v510_v54  ;;  %v147_v7 = vmul.f32 %v146_v58, %v510_v54  ;;  %s612_s14 = sld [smem:[#allocation4 + $0xa]] }
  0x48   :  { %v400_v61 = vpop.eup %399  ;;  %v170_v55 = vstv %s538_s1  ;;  %v173_v57 = vstv %s540_s21  ;;  %v194_v58 = vstv %s544_s23  ;;  %s615_s15 = sld [smem:[#allocation4 + $0xb]] }
  0x49   :  { %v520_v4 = vadd.f32 %v483_v1, %v71_v59  ;;  %v94_v5 = vadd.f32 1.0, %v400_v61  ;;  %v218_v59 = vstv %s550_s26  ;;  %s389_s16 = sld [smem:[#allocation3 + $0x24]] }
  0x4a   :  { %s390_s17 = sld [smem:[#allocation3 + $0x25]] }
  0x4b   :  { %v95_v8 = vmul.f32 %v94_v5, %v87_v60  ;;  %v102_v9 = vmul.f32 %v101_v63, %v520_v4  ;;  %v126_v10 = vmul.f32 %v125_v3, %v520_v4  ;;  %v150_v11 = vmul.f32 %v149_v0, %v520_v4  ;;  %s391_s18 = sld [smem:[#allocation3 + $0x26]] }
  0x4c   :  { %v221_v63 = vstv %s552_s27  ;;  %v177_v0 = vstv %s542_s22  ;;  %v201_v5 = vstv %s548_s25  ;;  %s392_s19 = sld [smem:[#allocation4 + $0xc]] }
  0x4d   :  { %v531_v1 = vadd.f32 %v488_v2, %v95_v8  ;;  %v103_v15 = vadd.f32 %v102_v9, %v99_v62  ;;  %v127_v16 = vadd.f32 %v126_v10, %v123_v6  ;;  %v151_v17 = vadd.f32 %v150_v11, %v147_v7 }
  0x4e   :  { %v197_v62 = vstv %s546_s24  ;;  %v225_v6 = vstv %s554_s28 }
  0x4f   :  { %v106_v18 = vmul.f32 %v105_v12, %v531_v1  ;;  %v130_v19 = vmul.f32 %v129_v13, %v531_v1  ;;  %v154_v20 = vmul.f32 %v153_v14, %v531_v1 }
  0x51   :  { %v107_v24 = vadd.f32 %v106_v18, %v103_v15  ;;  %v131_v25 = vadd.f32 %v130_v19, %v127_v16  ;;  %v155_v26 = vadd.f32 %v154_v20, %v151_v17  ;;  %v181_v17 = vstv %s556_s29 }
  0x52   :  { %v205_v18 = vstv %s558_s30  ;;  %v229_v19 = vstv %s561_s4 }
  0x53   :  { %v110_v27 = vadd.f32 %v109_v21, %v107_v24  ;;  %v134_v28 = vadd.f32 %v133_v22, %v131_v25  ;;  %v158_v29 = vadd.f32 %v157_v23, %v155_v26 }
  0x55   :  { %v112_v2 = vmul.f32 %v110_v27, %v110_v27  ;;  %v136_v30 = vmul.f32 %v134_v28, %v134_v28  ;;  %v160_v31 = vmul.f32 %v158_v29, %v158_v29  ;;  %v111_v44 = vmul.f32 0.5, %v110_v27 }
  0x56   :  { %v135_v46 = vmul.f32 0.5, %v134_v28  ;;  %v159_v49 = vmul.f32 0.5, %v158_v29 }
  0x57   :  { %v113_v32 = vmul.f32 %v112_v2, %v110_v27  ;;  %v137_v33 = vmul.f32 %v136_v30, %v134_v28  ;;  %v161_v34 = vmul.f32 %v160_v31, %v158_v29 }
  0x59   :  { %v114_v35 = vmul.f32 0.044715, %v113_v32  ;;  %v138_v36 = vmul.f32 0.044715, %v137_v33  ;;  %v162_v37 = vmul.f32 0.044715, %v161_v34 }
  0x5b   :  { %v115_v38 = vadd.f32 %v114_v35, %v110_v27  ;;  %v139_v39 = vadd.f32 %v138_v36, %v134_v28  ;;  %v163_v40 = vadd.f32 %v162_v37, %v158_v29 }
  0x5d   :  { %v116_v41 = vmul.f32 0.7978846, %v115_v38  ;;  %v140_v42 = vmul.f32 0.7978846, %v139_v39  ;;  %v164_v43 = vmul.f32 0.7978846, %v163_v40 }
  0x5f   :  { %401 = vtanh.f32 %v116_v41 }
  0x60   :  { %403 = vtanh.f32 %v140_v42 }
  0x61   :  { %405 = vtanh.f32 %v164_v43 }
  0x6c   :  { %v402_v45 = vpop.eup %401 }
  0x6d   :  { %v404_v47 = vpop.eup %403  ;;  %v118_v48 = vadd.f32 1.0, %v402_v45 }
  0x6e   :  { %v406_v50 = vpop.eup %405  ;;  %v142_v51 = vadd.f32 1.0, %v404_v47 }
  0x6f   :  { %v119_v52 = vmul.f32 %v118_v48, %v111_v44  ;;  %v166_v53 = vadd.f32 1.0, %v406_v50  ;;  %v242_v50 = vstv %s592_s5 }
  0x70   :  { %v143_v56 = vmul.f32 %v142_v51, %v135_v46 }
  0x71   :  { %v567_v60 = vadd.f32 %v119_v52, %v510_v54  ;;  %v167_v61 = vmul.f32 %v166_v53, %v159_v49  ;;  %v245_v52 = vstv %s594_s6  ;;  %v266_v53 = vstv %s598_s8 }
  0x72   :  { %v572_v3 = vadd.f32 %v143_v56, %v520_v4 }
  0x73   :  { %v578_v7 = vadd.f32 %v167_v61, %v531_v1  ;;  %v171_v8 = vmul.f32 %v170_v55, %v567_v60  ;;  %v195_v54 = vmul.f32 %v194_v58, %v567_v60  ;;  %v219_v9 = vmul.f32 %v218_v59, %v567_v60 }
  0x74   :  { %v174_v10 = vmul.f32 %v173_v57, %v572_v3  ;;  %v198_v4 = vmul.f32 %v197_v62, %v572_v3  ;;  %v222_v11 = vmul.f32 %v221_v63, %v572_v3  ;;  %v290_v55 = vstv %s604_s10 }
  0x75   :  { %v178_v12 = vmul.f32 %v177_v0, %v578_v7  ;;  %v202_v13 = vmul.f32 %v201_v5, %v578_v7  ;;  %v226_v14 = vmul.f32 %v225_v6, %v578_v7  ;;  %v269_v58 = vstv %s600_s9 }
  0x76   :  { %v175_v1 = vadd.f32 %v174_v10, %v171_v8  ;;  %v199_v15 = vadd.f32 %v198_v4, %v195_v54  ;;  %v223_v16 = vadd.f32 %v222_v11, %v219_v9  ;;  %v293_v59 = vstv %s606_s11 }
  0x77   :  { %v249_v62 = vstv %s596_s7  ;;  %v273_v63 = vstv %s602_s2  ;;  %v297_v0 = vstv %s608_s12 }
  0x78   :  { %v179_v20 = vadd.f32 %v178_v12, %v175_v1  ;;  %v203_v21 = vadd.f32 %v202_v13, %v199_v15  ;;  %v227_v22 = vadd.f32 %v226_v14, %v223_v16  ;;  %v253_v1 = vstv %s610_s13 }
  0x79   :  { %v301_v15 = vstv %s615_s15 }
  0x7a   :  { %v182_v23 = vadd.f32 %v181_v17, %v179_v20  ;;  %v206_v24 = vadd.f32 %v205_v18, %v203_v21  ;;  %v230_v25 = vadd.f32 %v229_v19, %v227_v22 }
  0x7c   :  { %v184_v26 = vmul.f32 %v182_v23, %v182_v23  ;;  %v208_v27 = vmul.f32 %v206_v24, %v206_v24  ;;  %v232_v28 = vmul.f32 %v230_v25, %v230_v25  ;;  %v183_v40 = vmul.f32 0.5, %v182_v23 }
  0x7d   :  { %v207_v42 = vmul.f32 0.5, %v206_v24  ;;  %v231_v45 = vmul.f32 0.5, %v230_v25 }
  0x7e   :  { %v185_v29 = vmul.f32 %v184_v26, %v182_v23  ;;  %v209_v2 = vmul.f32 %v208_v27, %v206_v24  ;;  %v233_v30 = vmul.f32 %v232_v28, %v230_v25 }
  0x80   :  { %v186_v31 = vmul.f32 0.044715, %v185_v29  ;;  %v210_v32 = vmul.f32 0.044715, %v209_v2  ;;  %v234_v33 = vmul.f32 0.044715, %v233_v30 }
  0x82   :  { %v187_v34 = vadd.f32 %v186_v31, %v182_v23  ;;  %v211_v35 = vadd.f32 %v210_v32, %v206_v24  ;;  %v235_v36 = vadd.f32 %v234_v33, %v230_v25 }
  0x84   :  { %v188_v37 = vmul.f32 0.7978846, %v187_v34  ;;  %v212_v38 = vmul.f32 0.7978846, %v211_v35  ;;  %v236_v39 = vmul.f32 0.7978846, %v235_v36 }
  0x86   :  { %407 = vtanh.f32 %v188_v37 }
  0x87   :  { %409 = vtanh.f32 %v212_v38 }
  0x88   :  { %411 = vtanh.f32 %v236_v39 }
  0x93   :  { %v408_v41 = vpop.eup %407 }
  0x94   :  { %v410_v43 = vpop.eup %409  ;;  %v190_v44 = vadd.f32 1.0, %v408_v41 }
  0x95   :  { %v412_v46 = vpop.eup %411  ;;  %v214_v47 = vadd.f32 1.0, %v410_v43 }
  0x96   :  { %v191_v48 = vmul.f32 %v190_v44, %v183_v40  ;;  %v238_v49 = vadd.f32 1.0, %v412_v46 }
  0x97   :  { %v215_v51 = vmul.f32 %v214_v47, %v207_v42  ;;  %v314_v47 = vstv %s389_s16 }
  0x98   :  { %v621_v56 = vadd.f32 %v191_v48, %v567_v60  ;;  %v239_v57 = vmul.f32 %v238_v49, %v231_v45 }
  0x99   :  { %v626_v61 = vadd.f32 %v215_v51, %v572_v3 }
  0x9a   :  { %v240_v5 = vadd.f32 %v239_v57, %v578_v7  ;;  %v243_v6 = vmul.f32 %v242_v50, %v621_v56  ;;  %v267_v8 = vmul.f32 %v266_v53, %v621_v56  ;;  %v291_v60 = vmul.f32 %v290_v55, %v621_v56 }
  0x9b   :  { %v246_v54 = vmul.f32 %v245_v52, %v626_v61  ;;  %v270_v9 = vmul.f32 %v269_v58, %v626_v61  ;;  %v294_v3 = vmul.f32 %v293_v59, %v626_v61  ;;  %v277_v7 = vstv %s612_s14 }
  0x9c   :  { %v250_v10 = vmul.f32 %v249_v62, %v240_v5  ;;  %v274_v4 = vmul.f32 %v273_v63, %v240_v5  ;;  %v298_v11 = vmul.f32 %v297_v0, %v240_v5  ;;  %v317_v50 = vstv %s390_s17 }
  0x9d   :  { %v247_v12 = vadd.f32 %v246_v54, %v243_v6  ;;  %v271_v13 = vadd.f32 %v270_v9, %v267_v8  ;;  %v295_v14 = vadd.f32 %v294_v3, %v291_v60  ;;  %v321_v52 = vstv %s391_s18 }
  0x9e   :  { %v325_v62 = vstv %s392_s19 }
  0x9f   :  { %v251_v16 = vadd.f32 %v250_v10, %v247_v12  ;;  %v275_v17 = vadd.f32 %v274_v4, %v271_v13  ;;  %v299_v18 = vadd.f32 %v298_v11, %v295_v14 }
  0xa1   :  { %v254_v19 = vadd.f32 %v253_v1, %v251_v16  ;;  %v278_v20 = vadd.f32 %v277_v7, %v275_v17  ;;  %v302_v21 = vadd.f32 %v301_v15, %v299_v18 }
  0xa3   :  { %v256_v22 = vmul.f32 %v254_v19, %v254_v19  ;;  %v280_v23 = vmul.f32 %v278_v20, %v278_v20  ;;  %v304_v24 = vmul.f32 %v302_v21, %v302_v21  ;;  %v255_v36 = vmul.f32 0.5, %v254_v19 }
  0xa4   :  { %v279_v38 = vmul.f32 0.5, %v278_v20  ;;  %v303_v41 = vmul.f32 0.5, %v302_v21 }
  0xa5   :  { %v257_v25 = vmul.f32 %v256_v22, %v254_v19  ;;  %v281_v26 = vmul.f32 %v280_v23, %v278_v20  ;;  %v305_v27 = vmul.f32 %v304_v24, %v302_v21 }
  0xa7   :  { %v258_v28 = vmul.f32 0.044715, %v257_v25  ;;  %v282_v29 = vmul.f32 0.044715, %v281_v26  ;;  %v306_v2 = vmul.f32 0.044715, %v305_v27 }
  0xa9   :  { %v259_v30 = vadd.f32 %v258_v28, %v254_v19  ;;  %v283_v31 = vadd.f32 %v282_v29, %v278_v20  ;;  %v307_v32 = vadd.f32 %v306_v2, %v302_v21 }
  0xab   :  { %v260_v33 = vmul.f32 0.7978846, %v259_v30  ;;  %v284_v34 = vmul.f32 0.7978846, %v283_v31  ;;  %v308_v35 = vmul.f32 0.7978846, %v307_v32 }
  0xad   :  { %413 = vtanh.f32 %v260_v33 }
  0xae   :  { %415 = vtanh.f32 %v284_v34 }
  0xaf   :  { %417 = vtanh.f32 %v308_v35 }
  0xba   :  { %v414_v37 = vpop.eup %413 }
  0xbb   :  { %v416_v39 = vpop.eup %415  ;;  %v262_v40 = vadd.f32 1.0, %v414_v37 }
  0xbc   :  { %v418_v42 = vpop.eup %417  ;;  %v286_v43 = vadd.f32 1.0, %v416_v39 }
  0xbd   :  { %v263_v44 = vmul.f32 %v262_v40, %v255_v36  ;;  %v310_v45 = vadd.f32 1.0, %v418_v42 }
  0xbe   :  { %v287_v46 = vmul.f32 %v286_v43, %v279_v38 }
  0xbf   :  { %v264_v48 = vadd.f32 %v263_v44, %v621_v56  ;;  %v311_v49 = vmul.f32 %v310_v45, %v303_v41 }
  0xc0   :  { %v288_v51 = vadd.f32 %v287_v46, %v626_v61 }
  0xc1   :  { %v312_v53 = vadd.f32 %v311_v49, %v240_v5  ;;  %v315_v55 = vmul.f32 %v314_v47, %v264_v48 }
  0xc2   :  { %v318_v57 = vmul.f32 %v317_v50, %v288_v51 }
  0xc3   :  { %v322_v58 = vmul.f32 %v321_v52, %v312_v53 }
  0xc4   :  { %v319_v59 = vadd.f32 %v318_v57, %v315_v55 }
  0xc6   :  { %v323_v63 = vadd.f32 %v322_v58, %v319_v59 }
  0xc8   :  { %v326_v0 = vadd.f32 %v325_v62, %v323_v63 }
  0xca   :  { %v328_v6 = vmul.f32 %v326_v0, %v326_v0  ;;  %v327_v56 = vmul.f32 0.5, %v326_v0 }
  0xcc   :  { %v329_v8 = vmul.f32 %v328_v6, %v326_v0 }
  0xce   :  { %v330_v60 = vmul.f32 0.044715, %v329_v8 }
  0xd0   :  { %v331_v54 = vadd.f32 %v330_v60, %v326_v0 }
  0xd2   :  { %v332_v9 = vmul.f32 0.7978846, %v331_v54 }
  0xd4   :  { %419 = vtanh.f32 %v332_v9 }
  0xe1   :  { %v420_v3 = vpop.eup %419 }
  0xe2   :  { %v334_v10 = vadd.f32 1.0, %v420_v3 }
  0xe4   :  { %v335_v4 = vmul.f32 %v334_v10, %v327_v56 }
  0xe6   :  { %336 = vst [vmem:[%s648_s3] sm:$0xff] %v335_v4 }

</bundles_post_ra>
